<compile_context>
chip_gen: v5e
topology: v5e:2x2
jax: 0.10.0
libtpu: 0.0.40
codegen_flags: <defaults>
</compile_context>

<pallas_src>
import functools

import jax
import jax.numpy as jnp
from jax.experimental import pallas as pl
from jax.experimental.pallas import tpu as pltpu


def _gau_dice_partial_kernel(pred_ref, tgt_ref, folds_ref, bsum_ref, *,
                             inv_w, binary_target):
    t = pl.program_id(1)

    @pl.when(t == 0)
    def _init():
        folds_ref[...] = jnp.zeros_like(folds_ref)
        bsum_ref[...] = jnp.zeros_like(bsum_ref)

    x = pred_ref[...].astype(jnp.float32)          # (B, TH, W)
    g = tgt_ref[...].astype(jnp.float32)

    # sigmoid(x) = 0.5*(tanh(0.5*x)+1): one EUP transcendental instead of
    # exp + reciprocal.
    p = 0.5 * (jnp.tanh(0.5 * x) + 1.0)

    pg = p * g
    pp = p * p

    b, th, w = p.shape

    def fold(a):
        # (B, TH, W) -> (B, 8, W): sum row-groups of 8.  TH % 8 == 0, so the
        # reshape splits the sublane dim exactly at vreg boundaries and the
        # axis=1 sum lowers to pure VPU vreg adds (no XLU).  The final 8 -> 1
        # sublane finish happens once in the wrapper.
        return jnp.sum(a.reshape(b, th // 8, 8, w), axis=1)

    fold_g = fold(g)
    # Fold accumulator slots:
    #   0: p   -> w-projection column sums + per-instance sum(p)  (naive dice)
    #   1: g   -> w-projection column sums + per-instance sum(g)
    #   2: p*g -> dice numerator
    #   3: p*p -> dice denominator
    #   4: g*g -> dice denominator (== slot 1's fold for hard binary targets)
    folds_ref[0] += fold(p)
    folds_ref[1] += fold_g
    folds_ref[2] += fold(pg)
    folds_ref[3] += fold(pp)
    folds_ref[4] += fold_g if binary_target else fold(g * g)

    # h-projection BCE.  Each row's W sum is complete here (W is never tiled),
    # so log() is only applied after full accumulation.  These two lane
    # reduces are the only remaining cross-lane (XLU) work; keeping them here
    # keeps hp/hg lane-dense (TH on lanes) so the EUP logs are ~free.
    rs_p = jnp.sum(p, axis=2)                      # (B, TH)
    rs_g = jnp.sum(g, axis=2)
    hp = jnp.clip(rs_p * inv_w, 0.0, 1.0)          # clip: f32 round-up past 1.0
    hg = jnp.clip(rs_g * inv_w, 0.0, 1.0)          #       would NaN log(1-hp)
    log_hp = jnp.maximum(jnp.log(hp), -100.0)      # torch.BCELoss log clamp
    log_1mhp = jnp.maximum(jnp.log(1.0 - hp), -100.0)
    bce_h = -(hg * log_hp + (1.0 - hg) * log_1mhp)
    bsum_ref[...] += jnp.sum(bce_h, axis=1, keepdims=True)   # (B, 1)


def _round_up(x, m):
    return ((x + m - 1) // m) * m


def _choose_tiling(B, H, W, *, num_cores, block_cap_bytes):
    """Pick (t_steps, tile_h, H_pad).

    tile_h is a multiple of 8, one f32 input block (B, tile_h, W) stays under
    block_cap_bytes, and H_pad == num_cores * t_steps * tile_h (row padding is
    at most ~8 * num_cores * t_steps)."""
    cap_rows = max(8, (block_cap_bytes // max(B * W * 4, 1)) // 8 * 8)
    rows_per_core = _round_up(pl.cdiv(H, num_cores), 8)
    t_steps = pl.cdiv(rows_per_core, cap_rows)
    tile_h = _round_up(pl.cdiv(rows_per_core, t_steps), 8)
    return t_steps, tile_h, num_cores * t_steps * tile_h


def _hw_config():
    """Per-generation budgets.

    v7x: 64 MiB VMEM per TC, 2 TensorCores -> small blocks, tight vmem limit,
         2-way 'parallel' core split.
    v5e / v6e (and other 128 MiB parts): larger blocks, higher limit, 1 core.
    Unknown devices get the conservative (v7x-like) budget."""
    kind = ""
    try:
        kind = jax.devices()[0].device_kind.lower()
    except Exception:
        pass
    is_v7 = ("tpu" in kind) and ("7" in kind)
    small_vmem = is_v7 or ("tpu" not in kind)
    num_cores = 2 if is_v7 else 1
    block_cap_bytes = (3 if small_vmem else 8) * 1024 * 1024
    vmem_limit_bytes = (40 if small_vmem else 96) * 1024 * 1024
    return num_cores, block_cap_bytes, vmem_limit_bytes


def gau_dice_loss_pallas(pred, target, *, eps=1e-4, loss_weight=1.0,
                         naive_dice=False, assume_binary_target=False,
                         num_cores=None, block_cap_bytes=None,
                         vmem_limit_bytes=None):
    """pred: (B,H,W) raw logits; target: (B,H,W) mask in [0,1]. Returns scalar f32."""
    assert pred.ndim == 3 and pred.shape == target.shape
    B, H, W = pred.shape

    auto_cores, auto_cap, auto_vmem = _hw_config()
    nc = auto_cores if num_cores is None else num_cores
    cap = auto_cap if block_cap_bytes is None else block_cap_bytes
    vmem_limit = auto_vmem if vmem_limit_bytes is None else vmem_limit_bytes

    if not jnp.issubdtype(pred.dtype, jnp.floating):
        pred = pred.astype(jnp.float32)
    if not jnp.issubdtype(target.dtype, jnp.floating):
        target = target.astype(jnp.float32)

    t_steps, tile_h, H_pad = _choose_tiling(B, H, W, num_cores=nc,
                                            block_cap_bytes=cap)

    if H_pad != H:
        # Pad rows: pred = -1e30 (sigmoid -> exactly 0), target = 0, so padded
        # rows contribute 0 to every fold, column sum and BCE term.
        pad = ((0, 0), (0, H_pad - H), (0, 0))
        pred = jnp.pad(pred, pad, constant_values=-1e30)
        target = jnp.pad(target, pad, constant_values=0)

    kernel = functools.partial(_gau_dice_partial_kernel, inv_w=1.0 / W,
                               binary_target=assume_binary_target)

    in_spec = pl.BlockSpec((B, tile_h, W), lambda c, t: (0, c * t_steps + t, 0))
    grid_spec = pltpu.PrefetchScalarGridSpec(
        num_scalar_prefetch=0,
        grid=(nc, t_steps),
        in_specs=[in_spec, in_spec],
        out_specs=[
            pl.BlockSpec((None, 5, B, 8, W), lambda c, t: (c, 0, 0, 0, 0)),
            pl.BlockSpec((None, B, 1), lambda c, t: (c, 0, 0)),
        ],
    )

    bytes_in = B * H_pad * W * (jnp.dtype(pred.dtype).itemsize
                                + jnp.dtype(target.dtype).itemsize)
    cost = pl.CostEstimate(
        flops=14 * B * H_pad * W,
        transcendentals=B * H_pad * W + 2 * B * H_pad,   # tanh + 2 logs/row
        bytes_accessed=bytes_in + nc * (5 * B * 8 * W + B) * 4,
    )

    folds, bsum = pl.pallas_call(
        kernel,
        grid_spec=grid_spec,
        out_shape=(
            jax.ShapeDtypeStruct((nc, 5, B, 8, W), jnp.float32),
            jax.ShapeDtypeStruct((nc, B, 1), jnp.float32),
        ),
        compiler_params=pltpu.CompilerParams(
            dimension_semantics=("parallel", "arbitrary"),
            vmem_limit_bytes=vmem_limit,
        ),
        cost_estimate=cost,
    )(pred, target)

    # ---- tiny O(B*W) finalize in plain JAX: combine per-core partials -------
    folds = jnp.sum(folds, axis=0)                 # (5, B, 8, W)
    bsum = jnp.sum(bsum, axis=0)[:, 0]             # (B,)

    col_p = jnp.sum(folds[0], axis=1)              # (B, W) column sums of p
    col_g = jnp.sum(folds[1], axis=1)
    sum_p = jnp.sum(folds[0], axis=(1, 2))         # (B,)
    sum_g = jnp.sum(folds[1], axis=(1, 2))
    sum_pg = jnp.sum(folds[2], axis=(1, 2))
    sum_pp = jnp.sum(folds[3], axis=(1, 2))
    sum_gg = jnp.sum(folds[4], axis=(1, 2))

    # w-projection BCE: log only after the projection is fully accumulated.
    wp_p = jnp.clip(col_p / H, 0.0, 1.0)
    wp_g = jnp.clip(col_g / H, 0.0, 1.0)
    log_wp = jnp.maximum(jnp.log(wp_p), -100.0)
    log_1mwp = jnp.maximum(jnp.log(1.0 - wp_p), -100.0)
    kl_w = jnp.mean(-(wp_g * log_wp + (1.0 - wp_g) * log_1mwp))
    kl_h = jnp.sum(bsum) / (B * H)
    kld = kl_h + kl_w

    a = sum_pg
    if naive_dice:
        d = (2.0 * a + eps) / (sum_p + sum_g + eps)
    else:
        d = 2.0 * a / (sum_pp + eps + sum_gg + eps)
    dice = 1.0 - d                                  # (B,)
    return (loss_weight * (jnp.mean(dice) + kld)).astype(jnp.float32)


# ----------------- pure-JAX reference (for verification) -----------------
def _gau_dice_loss_ref(pred_logits, target, eps=1e-4, loss_weight=1.0,
                       naive_dice=False):
    pred = jax.nn.sigmoid(pred_logits.astype(jnp.float32))
    gt = target.astype(jnp.float32)
    b, h, w = pred.shape
    h_pp = pred.sum(2) / w
    w_pp = pred.sum(1) / h
    h_pg = gt.sum(2) / w
    w_pg = gt.sum(1) / h

    def bce(p, y):
        lp = jnp.maximum(jnp.log(p), -100.0)
        l1 = jnp.maximum(jnp.log(1.0 - p), -100.0)
        return jnp.mean(-(y * lp + (1.0 - y) * l1))

    kld = bce(h_pp, h_pg) + bce(w_pp, w_pg)
    pf = pred.reshape(b, -1)
    gf = gt.reshape(b, -1)
    a = jnp.sum(pf * gf, 1)
    if naive_dice:
        d = (2 * a + eps) / (jnp.sum(pf, 1) + jnp.sum(gf, 1) + eps)
    else:
        d = 2 * a / (jnp.sum(pf * pf, 1) + eps + jnp.sum(gf * gf, 1) + eps)
    dice = 1.0 - d
    return loss_weight * jnp.mean(dice + kld)


if __name__ == "__main__":
    key = jax.random.PRNGKey(0)
    k1, k2, k3, k4, k5, k6 = jax.random.split(key, 6)

    # 1) Small typical mmdet-style mask shape (b, h, w): single tile.
    B, H, W = 2, 16, 16
    pred1 = jax.random.normal(k1, (B, H, W), dtype=jnp.float32)
    tgt1 = (jax.random.uniform(k2, (B, H, W)) > 0.5).astype(jnp.float32)
    out1 = jax.block_until_ready(gau_dice_loss_pallas(pred1, tgt1))
    ref1 = _gau_dice_loss_ref(pred1, tgt1)
    assert jnp.allclose(out1, ref1, rtol=1e-4, atol=1e-4), (out1, ref1)

    # 2) Forced 2-core + multi-tile accumulation path (tiny block cap).
    pred2 = jax.random.normal(k3, (2, 96, 128), dtype=jnp.float32)
    tgt2 = (jax.random.uniform(k4, (2, 96, 128)) > 0.5).astype(jnp.float32)
    out2 = jax.block_until_ready(gau_dice_loss_pallas(
        pred2, tgt2, num_cores=2, block_cap_bytes=32 * 1024))
    ref2 = _gau_dice_loss_ref(pred2, tgt2)
    assert jnp.allclose(out2, ref2, rtol=1e-4, atol=1e-4), (out2, ref2)

    # 3) H not a multiple of 8 (wrapper pads rows; padded rows contribute 0),
    #    soft (non-binary) targets, naive_dice branch.
    pred3 = jax.random.normal(k5, (3, 20, 64), dtype=jnp.float32)
    tgt3 = jax.random.uniform(k6, (3, 20, 64), dtype=jnp.float32)
    out3 = jax.block_until_ready(
        gau_dice_loss_pallas(pred3, tgt3, naive_dice=True))
    ref3 = _gau_dice_loss_ref(pred3, tgt3, naive_dice=True)
    assert jnp.allclose(out3, ref3, rtol=1e-4, atol=1e-4), (out3, ref3)

    # 4) bf16 inputs at the HBM boundary (f32 accumulation inside) + binary flag.
    pred4 = pred2.astype(jnp.bfloat16)
    tgt4 = tgt2.astype(jnp.bfloat16)
    out4 = jax.block_until_ready(gau_dice_loss_pallas(
        pred4, tgt4, assume_binary_target=True, block_cap_bytes=64 * 1024))
    ref4 = _gau_dice_loss_ref(pred4.astype(jnp.float32),
                              tgt4.astype(jnp.float32))
    assert jnp.allclose(out4, ref4, rtol=2e-3, atol=2e-3), (out4, ref4)

    print("KERNEL_OK")
</pallas_src>

<mosaic_0001>
module attributes {stable_mosaic.version = 11 : i64} {
  func.func @_gau_dice_partial_kernel(%arg0: i32, %arg1: i32, %arg2: memref<2x16x16xf32, #tpu.memory_space<vmem>>, %arg3: memref<2x16x16xf32, #tpu.memory_space<vmem>>, %arg4: memref<1x5x2x8x16xf32, #tpu.memory_space<vmem>>, %arg5: memref<1x2x1xf32, #tpu.memory_space<vmem>>) attributes {dimension_semantics = [#tpu.dimension_semantics<parallel>, #tpu.dimension_semantics<arbitrary>], iteration_bounds = array<i64: 1, 1>, scalar_prefetch = 0 : i64, scratch_operands = 0 : i64, tpu.core_type = #tpu.core_type<tc>, window_params = [{transform_indices = @transform_0, window_bounds = array<i64: 2, 16, 16>}, {transform_indices = @transform_1, window_bounds = array<i64: 2, 16, 16>}, {transform_indices = @transform_2, window_bounds = array<i64: 1, 5, 2, 8, 16>}, {transform_indices = @transform_3, window_bounds = array<i64: 1, 2, 1>}]} {
    %c0_i32 = arith.constant 0 : i32
    %0 = arith.cmpi eq, %arg1, %c0_i32 : i32
    %1 = arith.extui %0 : i1 to i32
    %c0_i32_0 = arith.constant 0 : i32
    %2 = arith.cmpi ne, %1, %c0_i32_0 : i32
    scf.if %2 {
      %cst_79 = arith.constant 0.000000e+00 : f32
      %92 = vector.broadcast %cst_79 : f32 to vector<5x2x8x16xf32>
      %c0_80 = arith.constant 0 : index
      %c0_81 = arith.constant 0 : index
      %c0_82 = arith.constant 0 : index
      %c0_83 = arith.constant 0 : index
      %c0_84 = arith.constant 0 : index
      %93 = vector.load %arg4[%c0_80, %c0_81, %c0_82, %c0_83, %c0_84] : memref<1x5x2x8x16xf32, #tpu.memory_space<vmem>>, vector<1x5x2x8x16xf32>
      %94 = vector.shape_cast %93 : vector<1x5x2x8x16xf32> to vector<5x2x8x16xf32>
      %95 = vector.shape_cast %92 : vector<5x2x8x16xf32> to vector<1x5x2x8x16xf32>
      tpu.vector_store %arg4[%c0_80, %c0_81, %c0_82, %c0_83, %c0_84], %95 {strides = array<i32>} : memref<1x5x2x8x16xf32, #tpu.memory_space<vmem>>, vector<1x5x2x8x16xf32>,
      %cst_85 = arith.constant 0.000000e+00 : f32
      %96 = vector.broadcast %cst_85 : f32 to vector<2x1xf32>
      %c0_86 = arith.constant 0 : index
      %c0_87 = arith.constant 0 : index
      %c0_88 = arith.constant 0 : index
      %97 = vector.load %arg5[%c0_86, %c0_87, %c0_88] : memref<1x2x1xf32, #tpu.memory_space<vmem>>, vector<1x2x1xf32>
      %98 = vector.shape_cast %97 : vector<1x2x1xf32> to vector<2x1xf32>
      %99 = vector.shape_cast %96 : vector<2x1xf32> to vector<1x2x1xf32>
      tpu.vector_store %arg5[%c0_86, %c0_87, %c0_88], %99 {strides = array<i32>} : memref<1x2x1xf32, #tpu.memory_space<vmem>>, vector<1x2x1xf32>,
    } else {
    }
    %c0 = arith.constant 0 : index
    %c0_1 = arith.constant 0 : index
    %c0_2 = arith.constant 0 : index
    %3 = vector.load %arg2[%c0, %c0_1, %c0_2] : memref<2x16x16xf32, #tpu.memory_space<vmem>>, vector<2x16x16xf32>
    %c0_3 = arith.constant 0 : index
    %c0_4 = arith.constant 0 : index
    %c0_5 = arith.constant 0 : index
    %4 = vector.load %arg3[%c0_3, %c0_4, %c0_5] : memref<2x16x16xf32, #tpu.memory_space<vmem>>, vector<2x16x16xf32>
    %cst = arith.constant 5.000000e-01 : f32
    %5 = vector.broadcast %cst : f32 to vector<2x16x16xf32>
    %6 = arith.mulf %5, %3 : vector<2x16x16xf32>
    %7 = math.tanh %6 : vector<2x16x16xf32>
    %cst_6 = arith.constant 1.000000e+00 : f32
    %8 = vector.broadcast %cst_6 : f32 to vector<2x16x16xf32>
    %9 = arith.addf %7, %8 : vector<2x16x16xf32>
    %cst_7 = arith.constant 5.000000e-01 : f32
    %10 = vector.broadcast %cst_7 : f32 to vector<2x16x16xf32>
    %11 = arith.mulf %10, %9 : vector<2x16x16xf32>
    %12 = arith.mulf %11, %4 : vector<2x16x16xf32>
    %13 = arith.mulf %11, %11 : vector<2x16x16xf32>
    %14 = vector.shape_cast %4 : vector<2x16x16xf32> to vector<2x2x8x16xf32>
    %cst_8 = arith.constant dense<0.000000e+00> : vector<2x8x16xf32>
    %15 = vector.multi_reduction <add>, %14, %cst_8 [1] : vector<2x2x8x16xf32> to vector<2x8x16xf32>
    %c0_9 = arith.constant 0 : index
    %c0_10 = arith.constant 0 : index
    %c0_11 = arith.constant 0 : index
    %c0_12 = arith.constant 0 : index
    %c0_13 = arith.constant 0 : index
    %16 = vector.load %arg4[%c0_9, %c0_10, %c0_11, %c0_12, %c0_13] : memref<1x5x2x8x16xf32, #tpu.memory_space<vmem>>, vector<1x1x2x8x16xf32>
    %17 = vector.shape_cast %16 : vector<1x1x2x8x16xf32> to vector<2x8x16xf32>
    %18 = vector.shape_cast %11 : vector<2x16x16xf32> to vector<2x2x8x16xf32>
    %cst_14 = arith.constant dense<0.000000e+00> : vector<2x8x16xf32>
    %19 = vector.multi_reduction <add>, %18, %cst_14 [1] : vector<2x2x8x16xf32> to vector<2x8x16xf32>
    %20 = arith.addf %17, %19 : vector<2x8x16xf32>
    %c0_15 = arith.constant 0 : index
    %c0_16 = arith.constant 0 : index
    %c0_17 = arith.constant 0 : index
    %c0_18 = arith.constant 0 : index
    %c0_19 = arith.constant 0 : index
    %21 = vector.load %arg4[%c0_15, %c0_16, %c0_17, %c0_18, %c0_19] : memref<1x5x2x8x16xf32, #tpu.memory_space<vmem>>, vector<1x1x2x8x16xf32>
    %22 = vector.shape_cast %21 : vector<1x1x2x8x16xf32> to vector<2x8x16xf32>
    %23 = vector.shape_cast %20 : vector<2x8x16xf32> to vector<1x1x2x8x16xf32>
    tpu.vector_store %arg4[%c0_15, %c0_16, %c0_17, %c0_18, %c0_19], %23 {strides = array<i32>} : memref<1x5x2x8x16xf32, #tpu.memory_space<vmem>>, vector<1x1x2x8x16xf32>,
    %c0_20 = arith.constant 0 : index
    %c1 = arith.constant 1 : index
    %c0_21 = arith.constant 0 : index
    %c0_22 = arith.constant 0 : index
    %c0_23 = arith.constant 0 : index
    %24 = vector.load %arg4[%c0_20, %c1, %c0_21, %c0_22, %c0_23] : memref<1x5x2x8x16xf32, #tpu.memory_space<vmem>>, vector<1x1x2x8x16xf32>
    %25 = vector.shape_cast %24 : vector<1x1x2x8x16xf32> to vector<2x8x16xf32>
    %26 = arith.addf %25, %15 : vector<2x8x16xf32>
    %c0_24 = arith.constant 0 : index
    %c1_25 = arith.constant 1 : index
    %c0_26 = arith.constant 0 : index
    %c0_27 = arith.constant 0 : index
    %c0_28 = arith.constant 0 : index
    %27 = vector.load %arg4[%c0_24, %c1_25, %c0_26, %c0_27, %c0_28] : memref<1x5x2x8x16xf32, #tpu.memory_space<vmem>>, vector<1x1x2x8x16xf32>
    %28 = vector.shape_cast %27 : vector<1x1x2x8x16xf32> to vector<2x8x16xf32>
    %29 = vector.shape_cast %26 : vector<2x8x16xf32> to vector<1x1x2x8x16xf32>
    tpu.vector_store %arg4[%c0_24, %c1_25, %c0_26, %c0_27, %c0_28], %29 {strides = array<i32>} : memref<1x5x2x8x16xf32, #tpu.memory_space<vmem>>, vector<1x1x2x8x16xf32>,
    %c0_29 = arith.constant 0 : index
    %c2 = arith.constant 2 : index
    %c0_30 = arith.constant 0 : index
    %c0_31 = arith.constant 0 : index
    %c0_32 = arith.constant 0 : index
    %30 = vector.load %arg4[%c0_29, %c2, %c0_30, %c0_31, %c0_32] : memref<1x5x2x8x16xf32, #tpu.memory_space<vmem>>, vector<1x1x2x8x16xf32>
    %31 = vector.shape_cast %30 : vector<1x1x2x8x16xf32> to vector<2x8x16xf32>
    %32 = vector.shape_cast %12 : vector<2x16x16xf32> to vector<2x2x8x16xf32>
    %cst_33 = arith.constant dense<0.000000e+00> : vector<2x8x16xf32>
    %33 = vector.multi_reduction <add>, %32, %cst_33 [1] : vector<2x2x8x16xf32> to vector<2x8x16xf32>
    %34 = arith.addf %31, %33 : vector<2x8x16xf32>
    %c0_34 = arith.constant 0 : index
    %c2_35 = arith.constant 2 : index
    %c0_36 = arith.constant 0 : index
    %c0_37 = arith.constant 0 : index
    %c0_38 = arith.constant 0 : index
    %35 = vector.load %arg4[%c0_34, %c2_35, %c0_36, %c0_37, %c0_38] : memref<1x5x2x8x16xf32, #tpu.memory_space<vmem>>, vector<1x1x2x8x16xf32>
    %36 = vector.shape_cast %35 : vector<1x1x2x8x16xf32> to vector<2x8x16xf32>
    %37 = vector.shape_cast %34 : vector<2x8x16xf32> to vector<1x1x2x8x16xf32>
    tpu.vector_store %arg4[%c0_34, %c2_35, %c0_36, %c0_37, %c0_38], %37 {strides = array<i32>} : memref<1x5x2x8x16xf32, #tpu.memory_space<vmem>>, vector<1x1x2x8x16xf32>,
    %c0_39 = arith.constant 0 : index
    %c3 = arith.constant 3 : index
    %c0_40 = arith.constant 0 : index
    %c0_41 = arith.constant 0 : index
    %c0_42 = arith.constant 0 : index
    %38 = vector.load %arg4[%c0_39, %c3, %c0_40, %c0_41, %c0_42] : memref<1x5x2x8x16xf32, #tpu.memory_space<vmem>>, vector<1x1x2x8x16xf32>
    %39 = vector.shape_cast %38 : vector<1x1x2x8x16xf32> to vector<2x8x16xf32>
    %40 = vector.shape_cast %13 : vector<2x16x16xf32> to vector<2x2x8x16xf32>
    %cst_43 = arith.constant dense<0.000000e+00> : vector<2x8x16xf32>
    %41 = vector.multi_reduction <add>, %40, %cst_43 [1] : vector<2x2x8x16xf32> to vector<2x8x16xf32>
    %42 = arith.addf %39, %41 : vector<2x8x16xf32>
    %c0_44 = arith.constant 0 : index
    %c3_45 = arith.constant 3 : index
    %c0_46 = arith.constant 0 : index
    %c0_47 = arith.constant 0 : index
    %c0_48 = arith.constant 0 : index
    %43 = vector.load %arg4[%c0_44, %c3_45, %c0_46, %c0_47, %c0_48] : memref<1x5x2x8x16xf32, #tpu.memory_space<vmem>>, vector<1x1x2x8x16xf32>
    %44 = vector.shape_cast %43 : vector<1x1x2x8x16xf32> to vector<2x8x16xf32>
    %45 = vector.shape_cast %42 : vector<2x8x16xf32> to vector<1x1x2x8x16xf32>
    tpu.vector_store %arg4[%c0_44, %c3_45, %c0_46, %c0_47, %c0_48], %45 {strides = array<i32>} : memref<1x5x2x8x16xf32, #tpu.memory_space<vmem>>, vector<1x1x2x8x16xf32>,
    %c0_49 = arith.constant 0 : index
    %c4 = arith.constant 4 : index
    %c0_50 = arith.constant 0 : index
    %c0_51 = arith.constant 0 : index
    %c0_52 = arith.constant 0 : index
    %46 = vector.load %arg4[%c0_49, %c4, %c0_50, %c0_51, %c0_52] : memref<1x5x2x8x16xf32, #tpu.memory_space<vmem>>, vector<1x1x2x8x16xf32>
    %47 = vector.shape_cast %46 : vector<1x1x2x8x16xf32> to vector<2x8x16xf32>
    %48 = arith.mulf %4, %4 : vector<2x16x16xf32>
    %49 = vector.shape_cast %48 : vector<2x16x16xf32> to vector<2x2x8x16xf32>
    %cst_53 = arith.constant dense<0.000000e+00> : vector<2x8x16xf32>
    %50 = vector.multi_reduction <add>, %49, %cst_53 [1] : vector<2x2x8x16xf32> to vector<2x8x16xf32>
    %51 = arith.addf %47, %50 : vector<2x8x16xf32>
    %c0_54 = arith.constant 0 : index
    %c4_55 = arith.constant 4 : index
    %c0_56 = arith.constant 0 : index
    %c0_57 = arith.constant 0 : index
    %c0_58 = arith.constant 0 : index
    %52 = vector.load %arg4[%c0_54, %c4_55, %c0_56, %c0_57, %c0_58] : memref<1x5x2x8x16xf32, #tpu.memory_space<vmem>>, vector<1x1x2x8x16xf32>
    %53 = vector.shape_cast %52 : vector<1x1x2x8x16xf32> to vector<2x8x16xf32>
    %54 = vector.shape_cast %51 : vector<2x8x16xf32> to vector<1x1x2x8x16xf32>
    tpu.vector_store %arg4[%c0_54, %c4_55, %c0_56, %c0_57, %c0_58], %54 {strides = array<i32>} : memref<1x5x2x8x16xf32, #tpu.memory_space<vmem>>, vector<1x1x2x8x16xf32>,
    %cst_59 = arith.constant dense<0.000000e+00> : vector<2x16xf32>
    %55 = vector.multi_reduction <add>, %11, %cst_59 [2] : vector<2x16x16xf32> to vector<2x16xf32>
    %cst_60 = arith.constant dense<0.000000e+00> : vector<2x16xf32>
    %56 = vector.multi_reduction <add>, %4, %cst_60 [2] : vector<2x16x16xf32> to vector<2x16xf32>
    %cst_61 = arith.constant 6.250000e-02 : f32
    %57 = vector.broadcast %cst_61 : f32 to vector<2x16xf32>
    %58 = arith.mulf %55, %57 : vector<2x16xf32>
    %cst_62 = arith.constant 0.000000e+00 : f32
    %cst_63 = arith.constant 1.000000e+00 : f32
    %59 = vector.broadcast %cst_62 : f32 to vector<2x16xf32>
    %60 = arith.maximumf %59, %58 : vector<2x16xf32>
    %61 = vector.broadcast %cst_63 : f32 to vector<2x16xf32>
    %62 = arith.minimumf %61, %60 : vector<2x16xf32>
    %cst_64 = arith.constant 6.250000e-02 : f32
    %63 = vector.broadcast %cst_64 : f32 to vector<2x16xf32>
    %64 = arith.mulf %56, %63 : vector<2x16xf32>
    %cst_65 = arith.constant 0.000000e+00 : f32
    %cst_66 = arith.constant 1.000000e+00 : f32
    %65 = vector.broadcast %cst_65 : f32 to vector<2x16xf32>
    %66 = arith.maximumf %65, %64 : vector<2x16xf32>
    %67 = vector.broadcast %cst_66 : f32 to vector<2x16xf32>
    %68 = arith.minimumf %67, %66 : vector<2x16xf32>
    %69 = math.log %62 : vector<2x16xf32>
    %cst_67 = arith.constant -1.000000e+02 : f32
    %70 = vector.broadcast %cst_67 : f32 to vector<2x16xf32>
    %71 = arith.maximumf %69, %70 : vector<2x16xf32>
    %cst_68 = arith.constant 1.000000e+00 : f32
    %72 = vector.broadcast %cst_68 : f32 to vector<2x16xf32>
    %73 = arith.subf %72, %62 : vector<2x16xf32>
    %74 = math.log %73 : vector<2x16xf32>
    %cst_69 = arith.constant -1.000000e+02 : f32
    %75 = vector.broadcast %cst_69 : f32 to vector<2x16xf32>
    %76 = arith.maximumf %74, %75 : vector<2x16xf32>
    %77 = arith.mulf %68, %71 : vector<2x16xf32>
    %cst_70 = arith.constant 1.000000e+00 : f32
    %78 = vector.broadcast %cst_70 : f32 to vector<2x16xf32>
    %79 = arith.subf %78, %68 : vector<2x16xf32>
    %80 = arith.mulf %79, %76 : vector<2x16xf32>
    %81 = arith.addf %77, %80 : vector<2x16xf32>
    %cst_71 = arith.constant 0.000000e+00 : f32
    %82 = vector.broadcast %cst_71 : f32 to vector<2x16xf32>
    %83 = arith.subf %82, %81 : vector<2x16xf32>
    %c0_72 = arith.constant 0 : index
    %c0_73 = arith.constant 0 : index
    %c0_74 = arith.constant 0 : index
    %84 = vector.load %arg5[%c0_72, %c0_73, %c0_74] : memref<1x2x1xf32, #tpu.memory_space<vmem>>, vector<1x2x1xf32>
    %85 = vector.shape_cast %84 : vector<1x2x1xf32> to vector<2x1xf32>
    %cst_75 = arith.constant dense<0.000000e+00> : vector<2xf32>
    %86 = vector.multi_reduction <add>, %83, %cst_75 [1] : vector<2x16xf32> to vector<2xf32>
    %87 = vector.shape_cast %86 : vector<2xf32> to vector<2x1xf32>
    %88 = arith.addf %85, %87 : vector<2x1xf32>
    %c0_76 = arith.constant 0 : index
    %c0_77 = arith.constant 0 : index
    %c0_78 = arith.constant 0 : index
    %89 = vector.load %arg5[%c0_76, %c0_77, %c0_78] : memref<1x2x1xf32, #tpu.memory_space<vmem>>, vector<1x2x1xf32>
    %90 = vector.shape_cast %89 : vector<1x2x1xf32> to vector<2x1xf32>
    %91 = vector.shape_cast %88 : vector<2x1xf32> to vector<1x2x1xf32>
    tpu.vector_store %arg5[%c0_76, %c0_77, %c0_78], %91 {strides = array<i32>} : memref<1x2x1xf32, #tpu.memory_space<vmem>>, vector<1x2x1xf32>,
    return
  }
  func.func @transform_0(%arg0: i32, %arg1: i32) -> (i32, i32, i32) {
    %c1_i32 = arith.constant 1 : i32
    %0 = arith.muli %arg0, %c1_i32 : i32
    %1 = arith.addi %0, %arg1 : i32
    %c0_i32 = arith.constant 0 : i32
    %c0_i32_0 = arith.constant 0 : i32
    %c0_i32_1 = arith.constant 0 : i32
    return %c0_i32, %1, %c0_i32_0 : i32, i32, i32
  }
  func.func @transform_1(%arg0: i32, %arg1: i32) -> (i32, i32, i32) {
    %c1_i32 = arith.constant 1 : i32
    %0 = arith.muli %arg0, %c1_i32 : i32
    %1 = arith.addi %0, %arg1 : i32
    %c0_i32 = arith.constant 0 : i32
    %c0_i32_0 = arith.constant 0 : i32
    %c0_i32_1 = arith.constant 0 : i32
    return %c0_i32, %1, %c0_i32_0 : i32, i32, i32
  }
  func.func @transform_2(%arg0: i32, %arg1: i32) -> (i32, i32, i32, i32, i32) {
    %c0_i32 = arith.constant 0 : i32
    %c0_i32_0 = arith.constant 0 : i32
    %c0_i32_1 = arith.constant 0 : i32
    %c0_i32_2 = arith.constant 0 : i32
    %c0_i32_3 = arith.constant 0 : i32
    return %arg0, %c0_i32, %c0_i32_0, %c0_i32_1, %c0_i32_2 : i32, i32, i32, i32, i32
  }
  func.func @transform_3(%arg0: i32, %arg1: i32) -> (i32, i32, i32) {
    %c0_i32 = arith.constant 0 : i32
    %c0_i32_0 = arith.constant 0 : i32
    %c0_i32_1 = arith.constant 0 : i32
    return %arg0, %c0_i32, %c0_i32_0 : i32, i32, i32
  }
}

</mosaic_0001>

<bundles_post_ra>
// kernel: tpu_custom_call.1
= control target key start
LH: loop header
LB: loop body
LE: loop exit
PB: predicated region body
PF: predicated region fallthrough
CT: control target
= control target key end

     0   :  { %9 = vsyncpa [#allocation3], 0  ;;  %s547_s0 = inlined_call_operand.hbm [shape: f32[2,16,16], index: 0, kind: input, shape index: {}]   ;;  %s548_s1 = inlined_call_operand.hbm [shape: f32[2,16,16], index: 1, kind: input, shape index: {}]   ;;  %s549_s2 = inlined_call_operand.hbm [shape: f32[1,5,2,8,16], index: 2, kind: output, shape index: {0}]   ;;  %s550_s3 = inlined_call_operand.vmem [shape: f32[1,2,1], index: 3, kind: output, shape index: {1}]  }
   0x1   :  { %10 = vsyncpa [#allocation6], 0 }
   0x2   :  { %11 = vsyncpa [#allocation4], 0  ;;  %s20_s14 = sshll.u32 %s547_s0, 4  ;;  %s421_s15 = smov [#allocation2]   ;;  %s21_s14 = int_to_ptr.hbm [resolvable:$true] %s20_s14 }
   0x3   :  { %s22_s16 = sshll.u32 %s421_s15, 4  ;;  %s37_s19 = sshll.u32 %s548_s1, 4  ;;  %s23_s16 = int_to_ptr.vmem [resolvable:$true] %s22_s16  ;;  %s38_s19 = int_to_ptr.hbm [resolvable:$true] %s37_s19 }
   0x4   :  { %s422_s20 = smov 128   ;;  %s423_s21 = smov 8  }
   0x5   :  { %28 = dma.hbm_to_vmem [thread:$0]  %s21_s14, 512, %s23_s16, [#allocation3], %s422_s20, %s422_s20, %s423_s21  }
   0x6   :  { %s424_s22 = smov [#allocation5]  }
   0x7   :  { %s39_s23 = sshll.u32 %s424_s22, 4  ;;  %s40_s23 = int_to_ptr.vmem [resolvable:$true] %s39_s23 }
   0x8   :  { %45 = dma.hbm_to_vmem [thread:$0]  %s38_s19, 512, %s40_s23, [#allocation6], %s422_s20, %s422_s20, %s423_s21  }
   0x9   :  { %415 = dma.done.wait [#allocation3], 512  }
   0xa   :  { %416 = vsyncadd [#allocation3], 4294966784 }
   0xb   :  { %417 = dma.done.wait [#allocation6], 512  }
   0xc   :  { %418 = vsyncadd [#allocation6], 4294966784  ;;  %vm62_vm0 = vcmask 130048   ;;  %v425_v0 = vmov 0.0   ;;  %v77_v1 = vld [vmem:[#allocation2 + $0x10] sm:$0xff]  ;;  %v75_v2 = vld [vmem:[#allocation2] sm:$0xff] }
   0xd   :  { %64 = vst.msk [vmem:[#allocation7 + $0x8] sm:$0xff] %vm62_vm0, %v425_v0  ;;  %v78_v3 = vld [vmem:[#allocation2 + $0x18] sm:$0xff]  ;;  %v85_v4 = vmul.f32 0.5, %v77_v1  ;;  %v83_v5 = vmul.f32 0.5, %v75_v2  ;;  %v76_v7 = vld [vmem:[#allocation2 + $0x8] sm:$0xff]  ;;  %v79_v9 = vld [vmem:[#allocation5] sm:$0xff] }
   0xe   :  { %70 = vst.msk [vmem:[#allocation7 + $0x38] sm:$0xff] %vm62_vm0, %v425_v0  ;;  %v86_v6 = vmul.f32 0.5, %v78_v3  ;;  %v84_v8 = vmul.f32 0.5, %v76_v7  ;;  %v81_v10 = vld [vmem:[#allocation5 + $0x10] sm:$0xff]  ;;  %v108_v11 = vsel %vm62_vm0, %v79_v9, 0.0  ;;  %v162_v12 = vmul.f32 %v79_v9, %v79_v9  ;;  %v483_v14 = vld [vmem:[#allocation5 + $0x8] sm:$0xff] }
   0xf   :  { %63 = vst.msk [vmem:[#allocation7] sm:$0xff] %vm62_vm0, %v425_v0  ;;  %319 = vtanh.f32 %v85_v4  ;;  %v481_v13 = vsel %vm62_vm0, %v81_v10, 0.0  ;;  %v485_v15 = vld [vmem:[#allocation5 + $0x18] sm:$0xff]  ;;  %184 = vadd.xlane.f32.xlu2 %v108_v11  ;;  %v164_v16 = vmul.f32 %v81_v10, %v81_v10  ;;  %v109_v17 = vsel %vm62_vm0, %v483_v14, 0.0  ;;  %s426_s24 = smov [#allocation7]   ;;  %s295_s28 = sshll.u32 %s549_s2, 4  ;;  %s296_s28 = int_to_ptr.hbm [resolvable:$true] %s295_s28 }
  0x10   :  { %65 = vst.msk [vmem:[#allocation7 + $0x10] sm:$0xff] %vm62_vm0, %v425_v0  ;;  %321 = vtanh.f32 %v83_v5  ;;  %v163_v18 = vmul.f32 %v483_v14, %v483_v14  ;;  %v166_v20 = vsel %vm62_vm0, %v162_v12, 0.0  ;;  %v110_v21 = vadd.f32 %v109_v17, %v108_v11  ;;  %s293_s25 = sshll.u32 %s426_s24, 4  ;;  %s294_s25 = int_to_ptr.vmem [resolvable:$true] %s293_s25 }
  0x11   :  { %66 = vst.msk [vmem:[#allocation7 + $0x18] sm:$0xff] %vm62_vm0, %v425_v0  ;;  %323 = vtanh.f32 %v86_v6  ;;  %v494_v22 = vsel %vm62_vm0, %v485_v15, 0.0  ;;  %v169_v26 = vsel %vm62_vm0, %v164_v16, 0.0  ;;  %v165_v29 = vmul.f32 %v485_v15, %v485_v15 }
  0x12   :  { %67 = vst.msk [vmem:[#allocation7 + $0x20] sm:$0xff] %vm62_vm0, %v425_v0  ;;  %325 = vtanh.f32 %v84_v8  ;;  %v167_v24 = vsel %vm62_vm0, %v163_v18, 0.0  ;;  %v113_v25 = vadd.f32 %v494_v22, %v481_v13  ;;  %vm73_vm1 = vcmask 1024  }
  0x13   :  { %68 = vst.msk [vmem:[#allocation7 + $0x28] sm:$0xff] %vm62_vm0, %v425_v0  ;;  %v168_v27 = vadd.f32 %v167_v24, %v166_v20  ;;  %v170_v33 = vsel %vm62_vm0, %v165_v29, 0.0  ;;  %vm274_vm2 = vcmask 130112   ;;  %vm279_vm3 = vcmask 1041409  }
  0x14   :  { %69 = vst.msk [vmem:[#allocation7 + $0x30] sm:$0xff] %vm62_vm0, %v425_v0  ;;  %v171_v37 = vadd.f32 %v170_v33, %v169_v26  ;;  %v115_v58 = vld [vmem:[#allocation7 + $0x8] sm:$0xff]  ;;  %vm282_vm4 = vcmask 123904  }
  0x15   :  { %71 = vst.msk [vmem:[#allocation7 + $0x40] sm:$0xff] %vm62_vm0, %v425_v0  ;;  %v320_v31 = vpop.eup %319  ;;  %v148_v3 = vld [vmem:[#allocation7 + $0x38] sm:$0xff] }
  0x16   :  { %72 = vst.msk [vmem:[#allocation7 + $0x48] sm:$0xff] %vm62_vm0, %v425_v0  ;;  %v322_v34 = vpop.eup %321  ;;  %v93_v35 = vadd.f32 1.0, %v320_v31  ;;  %v114_v1 = vld [vmem:[#allocation7] sm:$0xff] }
  0x17   :  { %v127_v19 = vld [vmem:[#allocation7 + $0x10] sm:$0xff]  ;;  %v324_v39 = vpop.eup %323  ;;  %v91_v40 = vadd.f32 1.0, %v322_v34  ;;  %186 = vadd.xlane.f32.xlu2 %v109_v17  ;;  %74 = vst.msk [vmem:[%s550_s3] sm:$0x3] %vm73_vm1, %v425_v0 }
  0x18   :  { %v128_v23 = vld [vmem:[#allocation7 + $0x18] sm:$0xff]  ;;  %v129_v28 = vadd.f32 %v127_v19, %v110_v21  ;;  %v326_v41 = vpop.eup %325  ;;  %v97_v42 = vmul.f32 0.5, %v93_v35  ;;  %v94_v43 = vadd.f32 1.0, %v324_v39 }
  0x19   :  { %v130_v30 = vadd.f32 %v128_v23, %v113_v25  ;;  %v95_v45 = vmul.f32 0.5, %v91_v40  ;;  %v92_v46 = vadd.f32 1.0, %v326_v41  ;;  %v134_v17 = vld [vmem:[#allocation7 + $0x20] sm:$0xff] }
  0x1a   :  { %131 = vst.msk [vmem:[#allocation7 + $0x10] sm:$0xff] %vm62_vm0, %v129_v28  ;;  %v119_v47 = vsel %vm62_vm0, %v97_v42, 0.0  ;;  %v105_v48 = vmul.f32 %v97_v42, %v97_v42  ;;  %v98_v49 = vmul.f32 0.5, %v94_v43  ;;  %v101_v50 = vmul.f32 %v97_v42, %v81_v10  ;;  %v135_v23 = vld [vmem:[#allocation7 + $0x28] sm:$0xff] }
  0x1b   :  { %132 = vst.msk [vmem:[#allocation7 + $0x18] sm:$0xff] %vm62_vm0, %v130_v30  ;;  %180 = vadd.xlane.f32.xlu1 %v119_v47  ;;  %v116_v51 = vsel %vm62_vm0, %v95_v45, 0.0  ;;  %v103_v52 = vmul.f32 %v95_v45, %v95_v45  ;;  %v96_v53 = vmul.f32 0.5, %v92_v46  ;;  %v99_v54 = vmul.f32 %v95_v45, %v79_v9  ;;  %v147_v10 = vld [vmem:[#allocation7 + $0x30] sm:$0xff] }
  0x1c   :  { %v160_v32 = vld [vmem:[#allocation7 + $0x40] sm:$0xff]  ;;  %v152_v55 = vsel %vm62_vm0, %v105_v48, 0.0  ;;  %176 = vadd.xlane.f32.xlu0 %v116_v51  ;;  %v106_v56 = vmul.f32 %v98_v49, %v98_v49  ;;  %v120_v57 = vsel %vm62_vm0, %v98_v49, 0.0  ;;  %v139_v59 = vsel %vm62_vm0, %v101_v50, 0.0 }
  0x1d   :  { %v172_v36 = vadd.f32 %v168_v27, %v160_v32  ;;  %v161_v38 = vld [vmem:[#allocation7 + $0x48] sm:$0xff]  ;;  %v149_v60 = vsel %vm62_vm0, %v103_v52, 0.0  ;;  %v121_v61 = vadd.f32 %v120_v57, %v119_v47  ;;  %v104_v62 = vmul.f32 %v96_v53, %v96_v53 }
  0x1e   :  { %v173_v44 = vadd.f32 %v171_v37, %v161_v38  ;;  %v117_v63 = vsel %vm62_vm0, %v96_v53, 0.0  ;;  %v153_v2 = vsel %vm62_vm0, %v106_v56, 0.0  ;;  %v136_v5 = vsel %vm62_vm0, %v99_v54, 0.0 }
  0x1f   :  { %174 = vst.msk [vmem:[#allocation7 + $0x40] sm:$0xff] %vm62_vm0, %v172_v36  ;;  %v118_v4 = vadd.f32 %v117_v63, %v116_v51  ;;  %v100_v6 = vmul.f32 %v96_v53, %v483_v14  ;;  %v123_v7 = vadd.f32 %v121_v61, %v115_v58  ;;  %v154_v8 = vadd.f32 %v153_v2, %v152_v55 }
  0x20   :  { %175 = vst.msk [vmem:[#allocation7 + $0x48] sm:$0xff] %vm62_vm0, %v173_v44  ;;  %v150_v9 = vsel %vm62_vm0, %v104_v62, 0.0  ;;  %v102_v11 = vmul.f32 %v98_v49, %v485_v15 }
  0x21   :  { %v122_v12 = vadd.f32 %v118_v4, %v114_v1  ;;  %v151_v16 = vadd.f32 %v150_v9, %v149_v60  ;;  %v137_v18 = vsel %vm62_vm0, %v100_v6, 0.0  ;;  %125 = vst.msk [vmem:[#allocation7 + $0x8] sm:$0xff] %vm62_vm0, %v123_v7  ;;  %v156_v19 = vadd.f32 %v154_v8, %v148_v3 }
  0x22   :  { %v138_v20 = vadd.f32 %v137_v18, %v136_v5  ;;  %v140_v21 = vsel %vm62_vm0, %v102_v11, 0.0  ;;  %v269_v8 = vlaneseq }
  0x23   :  { %124 = vst.msk [vmem:[#allocation7] sm:$0xff] %vm62_vm0, %v122_v12  ;;  %v155_v14 = vadd.f32 %v151_v16, %v147_v10  ;;  %v141_v24 = vadd.f32 %v140_v21, %v139_v59  ;;  %182 = vadd.xlane.f32.xlu1 %v120_v57 }
  0x24   :  { %158 = vst.msk [vmem:[#allocation7 + $0x38] sm:$0xff] %vm62_vm0, %v156_v19  ;;  %v142_v15 = vadd.f32 %v138_v20, %v134_v17  ;;  %178 = vadd.xlane.f32.xlu0 %v117_v63 }
  0x25   :  { %157 = vst.msk [vmem:[#allocation7 + $0x30] sm:$0xff] %vm62_vm0, %v155_v14  ;;  %v143_v25 = vadd.f32 %v141_v24, %v135_v23 }
  0x26   :  { %144 = vst.msk [vmem:[#allocation7 + $0x20] sm:$0xff] %vm62_vm0, %v142_v15 }
  0x27   :  { %145 = vst.msk [vmem:[#allocation7 + $0x28] sm:$0xff] %vm62_vm0, %v143_v25 }
  0x28   :  { %301 = dma.vmem_to_hbm [thread:$0]  %s294_s25, 1280, %s296_s28, [#allocation4], %s422_s20, %s422_s20, %s423_s21  }
  0x2b   :  { %190 = vadd.xlane.f32.xlu1 %v494_v22 }
  0x2c   :  { %188 = vadd.xlane.f32.xlu0 %v481_v13 }
  0x82   :  { %v185_v26 = vpop.xlane.xlu2 %184 }
  0x83   :  { %v204_v35 = vmul.f32 0.0625, %v185_v26 }
  0x85   :  { %v208_v41 = vmax.f32 %v204_v35, 0.0 }
  0x87   :  { %v212_v49 = vmin.f32 %v208_v41, 1.0 }
  0x89   :  { %v248_v59 = vsub.f32 1.0, %v212_v49 }
  0x8a   :  { %v187_v13 = vpop.xlane.xlu2 %186 }
  0x8b   :  { %v205_v44 = vmul.f32 0.0625, %v187_v13 }
  0x8d   :  { %v209_v54 = vmax.f32 %v205_v44, 0.0 }
  0x8e   :  { %v181_v27 = vpop.xlane.xlu1 %180 }
  0x8f   :  { %v194_v28 = vmul.f32 0.0625, %v181_v27  ;;  %v177_v29 = vpop.xlane.xlu0 %176  ;;  %v213_v5 = vmin.f32 %v209_v54, 1.0 }
  0x90   :  { %v192_v30 = vmul.f32 0.0625, %v177_v29 }
  0x91   :  { %v198_v31 = vmax.f32 %v194_v28, 0.0  ;;  %v249_v26 = vsub.f32 1.0, %v213_v5 }
  0x92   :  { %v196_v32 = vmax.f32 %v192_v30, 0.0 }
  0x93   :  { %v202_v33 = vmin.f32 %v198_v31, 1.0 }
  0x94   :  { %v200_v34 = vmin.f32 %v196_v32, 1.0  ;;  %v270_v32 = vand.u32 127, %v269_v8 }
  0x95   :  { %327 = vlog2.f32 %v202_v33  ;;  %v230_v36 = vsub.f32 1.0, %v202_v33 }
  0x96   :  { %329 = vlog2.f32 %v200_v34  ;;  %v228_v37 = vsub.f32 1.0, %v200_v34  ;;  %v183_v38 = vpop.xlane.xlu1 %182 }
  0x97   :  { %331 = vlog2.f32 %v230_v36  ;;  %v195_v22 = vmul.f32 0.0625, %v183_v38  ;;  %v179_v39 = vpop.xlane.xlu0 %178 }
  0x98   :  { %333 = vlog2.f32 %v228_v37  ;;  %v193_v40 = vmul.f32 0.0625, %v179_v39 }
  0x99   :  { %v199_v42 = vmax.f32 %v195_v22, 0.0  ;;  %v272_v22 = vadd.s32 4294967288, %v270_v32 }
  0x9a   :  { %v197_v43 = vmax.f32 %v193_v40, 0.0 }
  0x9b   :  { %v328_v45 = vpop.eup %327  ;;  %v203_v46 = vmin.f32 %v199_v42, 1.0 }
  0x9c   :  { %v330_v47 = vpop.eup %329  ;;  %v201_v48 = vmin.f32 %v197_v43, 1.0  ;;  %v221_v63 = vmul.f32 0.6931472, %v328_v45 }
  0x9d   :  { %v332_v50 = vpop.eup %331  ;;  %335 = vlog2.f32 %v203_v46  ;;  %v231_v51 = vsub.f32 1.0, %v203_v46  ;;  %v217_v0 = vmul.f32 0.6931472, %v330_v47 }
  0x9e   :  { %v334_v52 = vpop.eup %333  ;;  %337 = vlog2.f32 %v201_v48  ;;  %v229_v53 = vsub.f32 1.0, %v201_v48  ;;  %v191_v55 = vpop.xlane.xlu1 %190  ;;  %v237_v61 = vmul.f32 0.6931472, %v332_v50  ;;  %v226_v18 = vmax.f32 %v221_v63, -100.0 }
  0x9f   :  { %v233_v56 = vmul.f32 0.6931472, %v334_v52  ;;  %339 = vlog2.f32 %v231_v51  ;;  %v189_v57 = vpop.xlane.xlu0 %188  ;;  %v207_v58 = vmul.f32 0.0625, %v191_v55  ;;  %v224_v4 = vmax.f32 %v217_v0, -100.0  ;;  %v264_v51 = vld [vmem:[%s550_s3] sm:$0x3] }
  0xa0   :  { %341 = vlog2.f32 %v229_v53  ;;  %v206_v60 = vmul.f32 0.0625, %v189_v57  ;;  %v242_v12 = vmax.f32 %v237_v61, -100.0 }
  0xa1   :  { %v240_v62 = vmax.f32 %v233_v56, -100.0  ;;  %v211_v1 = vmax.f32 %v207_v58, 0.0  ;;  %v244_v15 = vmul.f32 %v224_v4, %v212_v49 }
  0xa2   :  { %v210_v2 = vmax.f32 %v206_v60, 0.0 }
  0xa3   :  { %v336_v3 = vpop.eup %335  ;;  %v215_v6 = vmin.f32 %v211_v1, 1.0  ;;  %v252_v17 = vmul.f32 %v248_v59, %v240_v62 }
  0xa4   :  { %v338_v7 = vpop.eup %337  ;;  %v214_v9 = vmin.f32 %v210_v2, 1.0  ;;  %v223_v10 = vmul.f32 0.6931472, %v336_v3 }
  0xa5   :  { %v340_v11 = vpop.eup %339  ;;  %v219_v16 = vmul.f32 0.6931472, %v338_v7  ;;  %v251_v14 = vsub.f32 1.0, %v215_v6  ;;  %v256_v31 = vadd.f32 %v252_v17, %v244_v15 }
  0xa6   :  { %v342_v19 = vpop.eup %341  ;;  %v239_v20 = vmul.f32 0.6931472, %v340_v11  ;;  %v250_v21 = vsub.f32 1.0, %v214_v9  ;;  %v227_v23 = vmax.f32 %v223_v10, -100.0  ;;  %v246_v28 = vmul.f32 %v226_v18, %v214_v9 }
  0xa7   :  { %v235_v24 = vmul.f32 0.6931472, %v342_v19  ;;  %v225_v25 = vmax.f32 %v219_v16, -100.0  ;;  %v260_v13 = vsub.f32 0.0, %v256_v31 }
  0xa8   :  { %v243_v27 = vmax.f32 %v239_v20, -100.0  ;;  %v254_v29 = vmul.f32 %v250_v21, %v242_v12  ;;  %v247_v34 = vmul.f32 %v227_v23, %v215_v6 }
  0xa9   :  { %v241_v30 = vmax.f32 %v235_v24, -100.0  ;;  %v245_v36 = vmul.f32 %v225_v25, %v213_v5  ;;  %v271_v45 = vperm.slane %v260_v13, %v270_v32 }
  0xaa   :  { %v258_v33 = vadd.f32 %v254_v29, %v246_v28  ;;  %v255_v35 = vmul.f32 %v251_v14, %v243_v27 }
  0xab   :  { %v253_v37 = vmul.f32 %v249_v26, %v241_v30 }
  0xac   :  { %v262_v38 = vsub.f32 0.0, %v258_v33  ;;  %v259_v39 = vadd.f32 %v255_v35, %v247_v34 }
  0xad   :  { %v257_v40 = vadd.f32 %v253_v37, %v245_v36 }
  0xae   :  { %v263_v41 = vsub.f32 0.0, %v259_v39  ;;  %v276_v43 = vperm.slane %v262_v38, %v270_v32 }
  0xaf   :  { %v261_v42 = vsub.f32 0.0, %v257_v40 }
  0xb0   :  { %v277_v44 = vperm.slane %v263_v41, %v272_v22 }
  0xb1   :  { %v273_v46 = vperm.slane %v261_v42, %v272_v22 }
  0xb2   :  { %v278_v47 = vsel %vm274_vm2, %v277_v44, %v276_v43 }
  0xb3   :  { %v275_v48 = vsel %vm274_vm2, %v273_v46, %v271_v45 }
  0xb4   :  { %v280_v49 = vsel %vm279_vm3, %v278_v47, %v275_v48 }
  0xb5   :  { %v283_v50 = vsel %vm282_vm4, %v280_v49, 0.0 }
  0xb6   :  { %284 = vadd.xlane.f32.xlu2 %v283_v50 }
 0x129   :  { %v285_v52 = vpop.xlane.xlu2 %284 }
 0x12a   :  { %v286_v53 = vadd.f32 %v285_v52, %v264_v51 }
 0x12c   :  { %288 = vst.msk [vmem:[%s550_s3] sm:$0x3] %vm73_vm1, %v286_v53 }
 0x12d   :  { %419 = dma.done.wait [#allocation4], 1280  }
 0x12e   :  { %420 = vsyncadd [#allocation4], 4294966016 }
 0x12f   :  { %310 = vsyncpa [#allocation3], 1 }
 0x130   :  { %311 = vsyncpa [#allocation6], 1 }
 0x131   :  { %312 = vsyncpa [#allocation4], 1 }

</bundles_post_ra>
